<compile_context>
chip_gen: v7x
topology: tpu7x:2x2x1
jax: 0.10.0
libtpu: 0.0.40
codegen_flags: <defaults>
</compile_context>

<pallas_src>
import functools
import math

import jax
import jax.numpy as jnp
from jax import lax
from jax.experimental import pallas as pl
from jax.experimental.pallas import tpu as pltpu


def get_positional_encoding(d_model: int, max_len: int) -> jnp.ndarray:
    """Fixed sin/cos positional encoding, shape [max_len, d_model] (fp32)."""
    pos = jnp.arange(max_len, dtype=jnp.float32)[:, None]                  # [max_len, 1]
    two_i = jnp.arange(0, d_model, 2, dtype=jnp.float32)                   # [d_model/2]
    div_term = jnp.exp(two_i * (-math.log(10000.0) / d_model))             # [d_model/2]
    pe = jnp.zeros((max_len, d_model), dtype=jnp.float32)
    pe = pe.at[:, 0::2].set(jnp.sin(pos * div_term))
    pe = pe.at[:, 1::2].set(jnp.cos(pos * div_term))
    return pe


def _embed_pe_kernel(ids_ref, pe_ref, emb_ref, o_ref, acc_ref, *, scale, tk):
    # ids_ref: (TM, 1)        int32 token ids for this token tile
    # pe_ref : (TM, d_model)  precomputed per-token positional encodings
    # emb_ref: (TK, d_model)  current vocab tile of the embedding table
    # o_ref  : (TM, d_model)  output tile (written on the last vocab step)
    # acc_ref: (TM, d_model)  f32 accumulator scratch
    k = pl.program_id(1)

    @pl.when(k == 0)
    def _():
        acc_ref[...] = jnp.zeros_like(acc_ref)

    tm = acc_ref.shape[0]
    # One-hot gather against this vocab window only (MXU matmul).  Ids outside
    # the window (incl. padded/out-of-range ids == -1) contribute zero rows.
    local_ids = ids_ref[...] - k * tk                                  # (TM, 1)
    vocab_iota = lax.broadcasted_iota(jnp.int32, (tm, tk), 1)          # (TM, TK)
    onehot = (local_ids == vocab_iota).astype(emb_ref.dtype)           # (TM, TK)
    acc_ref[...] += jnp.dot(onehot, emb_ref[...],
                            preferred_element_type=jnp.float32)        # (TM, d_model)

    @pl.when(k == pl.num_programs(1) - 1)
    def _():
        o_ref[...] = (acc_ref[...] * scale
                      + pe_ref[...].astype(jnp.float32)).astype(o_ref.dtype)


def _round_up(x: int, m: int) -> int:
    return ((x + m - 1) // m) * m


def embeddings_with_pe(x_ids: jnp.ndarray,
                       emb_table: jnp.ndarray,
                       pe: jnp.ndarray,
                       *,
                       tile_tokens: int = 256,
                       vocab_tile: int = 2048) -> jnp.ndarray:
    """x_ids: int32 [seq_len, batch]; emb_table: [n_vocab, d_model];
    pe: [max_len, d_model]. Returns [seq_len, batch, d_model]."""
    seq_len, batch = x_ids.shape
    n_vocab, d_model = emb_table.shape
    max_len = pe.shape[0]
    if seq_len > max_len:
        raise ValueError(f"seq_len={seq_len} exceeds positional-encoding "
                         f"max_len={max_len}")
    n_tok = seq_len * batch
    scale = math.sqrt(d_model)

    # --- Token tile: multiple of 8 sublanes; keep >= 2 tiles when possible so
    # the 'parallel' grid axis can shard across TensorCores.
    tm = _round_up(n_tok, 8)
    if n_tok >= 16:
        tm = min(tm, _round_up(pl.cdiv(n_tok, 2), 8))
    tm = min(tm, _round_up(tile_tokens, 8))
    n_tok_pad = _round_up(n_tok, tm)
    n_tiles = n_tok_pad // tm

    # --- Vocab tile: table streamed in (TK, d_model) blocks (double-buffered).
    tk = min(_round_up(n_vocab, 8), _round_up(vocab_tile, 8))
    n_vocab_pad = _round_up(n_vocab, tk)
    n_vocab_tiles = n_vocab_pad // tk
    emb_pad = emb_table
    if n_vocab_pad != n_vocab:
        emb_pad = jnp.pad(emb_table, ((0, n_vocab_pad - n_vocab), (0, 0)))

    # --- Flatten seq-major; padded / out-of-range ids select no row (zero emb).
    ids_flat = x_ids.reshape(-1).astype(jnp.int32)
    ids_col = jnp.pad(ids_flat, (0, n_tok_pad - n_tok),
                      constant_values=-1)[:, None]                        # (n_tok_pad, 1)

    # --- Host-side PE gather: flat token i has seq position i // batch.
    pos = jnp.minimum(jnp.arange(n_tok_pad, dtype=jnp.int32) // batch,
                      max_len - 1)                                        # clamp pads only
    pe_rows = pe[pos].astype(jnp.float32)                                 # (n_tok_pad, d_model)

    # --- VMEM budget derived from actual per-step footprint (double-buffered
    # emb/pe/id/out tiles + f32 accumulator), capped below v7x's 64 MiB.
    emb_bytes = emb_pad.dtype.itemsize
    out_bytes = emb_table.dtype.itemsize
    per_step = (2 * tk * d_model * emb_bytes
                + 2 * tm * d_model * 4
                + 2 * tm * 4
                + 2 * tm * d_model * out_bytes
                + tm * d_model * 4)
    vmem_limit = int(min(max(2 * per_step, 16 * 1024 * 1024), 56 * 1024 * 1024))

    grid_spec = pltpu.PrefetchScalarGridSpec(
        num_scalar_prefetch=0,
        grid=(n_tiles, n_vocab_tiles),          # reduction (vocab) axis last
        in_specs=[
            pl.BlockSpec((tm, 1), lambda t, k: (t, 0)),          # token ids
            pl.BlockSpec((tm, d_model), lambda t, k: (t, 0)),    # per-token PE rows
            pl.BlockSpec((tk, d_model), lambda t, k: (k, 0)),    # emb table tile
        ],
        out_specs=pl.BlockSpec((tm, d_model), lambda t, k: (t, 0)),
        scratch_shapes=[pltpu.VMEM((tm, d_model), jnp.float32)],
    )

    out_flat = pl.pallas_call(
        functools.partial(_embed_pe_kernel, scale=scale, tk=tk),
        out_shape=jax.ShapeDtypeStruct((n_tok_pad, d_model), emb_table.dtype),
        grid_spec=grid_spec,
        compiler_params=pltpu.CompilerParams(
            dimension_semantics=("parallel", "arbitrary"),
            vmem_limit_bytes=vmem_limit),
    )(ids_col, pe_rows, emb_pad)

    return out_flat[:n_tok].reshape(seq_len, batch, d_model)


if __name__ == "__main__":
    # Small shapes consistent with the module's forward (lane-dense d_model).
    seq_len, batch = 8, 2
    d_model, n_vocab, max_len = 128, 64, 16

    key = jax.random.PRNGKey(0)
    k_emb, k_ids = jax.random.split(key)

    # Deterministic synthetic parameters (nn.Embedding weight ~ N(0, 1)).
    emb_table = jax.random.normal(k_emb, (n_vocab, d_model), dtype=jnp.float32)
    pe = get_positional_encoding(d_model, max_len)

    # Token ids, [seq_len, batch].
    x_ids = jax.random.randint(k_ids, (seq_len, batch), 0, n_vocab, dtype=jnp.int32)

    out = embeddings_with_pe(x_ids, emb_table, pe)
    out = jax.block_until_ready(out)

    # Pure-JAX reference for correctness.
    ref = emb_table[x_ids] * math.sqrt(d_model) + pe[:seq_len][:, None, :]
    assert out.shape == (seq_len, batch, d_model)
    assert jnp.allclose(out, ref, atol=5e-3, rtol=5e-3), \
        float(jnp.max(jnp.abs(out - ref)))

    print("KERNEL_OK")
</pallas_src>

<mosaic_0001>
module attributes {stable_mosaic.version = 11 : i64} {
  func.func @_embed_pe_kernel(%arg0: i32, %arg1: i32, %arg2: memref<8x1xi32, #tpu.memory_space<vmem>>, %arg3: memref<8x128xf32, #tpu.memory_space<vmem>>, %arg4: memref<64x128xf32, #tpu.memory_space<vmem>>, %arg5: memref<8x128xf32, #tpu.memory_space<vmem>>, %arg6: memref<8x128xf32, #tpu.memory_space<vmem>>) attributes {dimension_semantics = [#tpu.dimension_semantics<parallel>, #tpu.dimension_semantics<arbitrary>], iteration_bounds = array<i64: 2, 1>, scalar_prefetch = 0 : i64, scratch_operands = 1 : i64, tpu.core_type = #tpu.core_type<tc>, window_params = [{transform_indices = @transform_0, window_bounds = array<i64: 8, 1>}, {transform_indices = @transform_1, window_bounds = array<i64: 8, 128>}, {transform_indices = @transform_2, window_bounds = array<i64: 64, 128>}, {transform_indices = @transform_3, window_bounds = array<i64: 8, 128>}]} {
    %c0_i32 = arith.constant 0 : i32
    %0 = arith.cmpi eq, %arg1, %c0_i32 : i32
    %1 = arith.extui %0 : i1 to i32
    %c0_i32_0 = arith.constant 0 : i32
    %2 = arith.cmpi ne, %1, %c0_i32_0 : i32
    scf.if %2 {
      %cst_10 = arith.constant 0.000000e+00 : f32
      %20 = vector.broadcast %cst_10 : f32 to vector<8x128xf32>
      %c0_11 = arith.constant 0 : index
      %c0_12 = arith.constant 0 : index
      %21 = vector.load %arg6[%c0_11, %c0_12] : memref<8x128xf32, #tpu.memory_space<vmem>>, vector<8x128xf32>
      tpu.vector_store %arg6[%c0_11, %c0_12], %20 {strides = array<i32>} : memref<8x128xf32, #tpu.memory_space<vmem>>, vector<8x128xf32>,
    } else {
    }
    %c0 = arith.constant 0 : index
    %c0_1 = arith.constant 0 : index
    %3 = vector.load %arg2[%c0, %c0_1] : memref<8x1xi32, #tpu.memory_space<vmem>>, vector<8x1xi32>
    %c64_i32 = arith.constant 64 : i32
    %4 = arith.muli %arg1, %c64_i32 : i32
    %5 = vector.broadcast %4 : i32 to vector<8x1xi32>
    %6 = arith.subi %3, %5 : vector<8x1xi32>
    %7 = tpu.iota {dimensions = array<i32: 1>} : vector<8x64xi32>
    %8 = vector.broadcast %6 : vector<8x1xi32> to vector<8x64xi32>
    %9 = arith.cmpi eq, %8, %7 : vector<8x64xi32>
    %10 = arith.extui %9 : vector<8x64xi1> to vector<8x64xi32>
    %11 = arith.sitofp %10 : vector<8x64xi32> to vector<8x64xf32>
    %c0_2 = arith.constant 0 : index
    %c0_3 = arith.constant 0 : index
    %12 = vector.load %arg6[%c0_2, %c0_3] : memref<8x128xf32, #tpu.memory_space<vmem>>, vector<8x128xf32>
    %c0_4 = arith.constant 0 : index
    %c0_5 = arith.constant 0 : index
    %13 = vector.load %arg4[%c0_4, %c0_5] : memref<64x128xf32, #tpu.memory_space<vmem>>, vector<64x128xf32>
    %cst = arith.constant dense<0.000000e+00> : vector<8x128xf32>
    %14 = tpu.matmul %11, %13, %cst {dimension_numbers = #tpu.dot_dimension_numbers<[1], [0], [0], [1], [0, 0, 1, 1], [], []>} : vector<8x64xf32>, vector<64x128xf32>, vector<8x128xf32> -> vector<8x128xf32>
    %15 = arith.addf %12, %14 : vector<8x128xf32>
    %c0_6 = arith.constant 0 : index
    %c0_7 = arith.constant 0 : index
    %16 = vector.load %arg6[%c0_6, %c0_7] : memref<8x128xf32, #tpu.memory_space<vmem>>, vector<8x128xf32>
    tpu.vector_store %arg6[%c0_6, %c0_7], %15 {strides = array<i32>} : memref<8x128xf32, #tpu.memory_space<vmem>>, vector<8x128xf32>,
    %c0_i32_8 = arith.constant 0 : i32
    %17 = arith.cmpi eq, %arg1, %c0_i32_8 : i32
    %18 = arith.extui %17 : i1 to i32
    %c0_i32_9 = arith.constant 0 : i32
    %19 = arith.cmpi ne, %18, %c0_i32_9 : i32
    scf.if %19 {
      %c0_10 = arith.constant 0 : index
      %c0_11 = arith.constant 0 : index
      %20 = vector.load %arg6[%c0_10, %c0_11] : memref<8x128xf32, #tpu.memory_space<vmem>>, vector<8x128xf32>
      %cst_12 = arith.constant 11.3137083 : f32
      %21 = vector.broadcast %cst_12 : f32 to vector<8x128xf32>
      %22 = arith.mulf %20, %21 : vector<8x128xf32>
      %c0_13 = arith.constant 0 : index
      %c0_14 = arith.constant 0 : index
      %23 = vector.load %arg3[%c0_13, %c0_14] : memref<8x128xf32, #tpu.memory_space<vmem>>, vector<8x128xf32>
      %24 = arith.addf %22, %23 : vector<8x128xf32>
      %c0_15 = arith.constant 0 : index
      %c0_16 = arith.constant 0 : index
      %25 = vector.load %arg5[%c0_15, %c0_16] : memref<8x128xf32, #tpu.memory_space<vmem>>, vector<8x128xf32>
      tpu.vector_store %arg5[%c0_15, %c0_16], %24 {strides = array<i32>} : memref<8x128xf32, #tpu.memory_space<vmem>>, vector<8x128xf32>,
    } else {
    }
    return
  }
  func.func @transform_0(%arg0: i32, %arg1: i32) -> (i32, i32) {
    %c0_i32 = arith.constant 0 : i32
    %c0_i32_0 = arith.constant 0 : i32
    return %arg0, %c0_i32 : i32, i32
  }
  func.func @transform_1(%arg0: i32, %arg1: i32) -> (i32, i32) {
    %c0_i32 = arith.constant 0 : i32
    %c0_i32_0 = arith.constant 0 : i32
    return %arg0, %c0_i32 : i32, i32
  }
  func.func @transform_2(%arg0: i32, %arg1: i32) -> (i32, i32) {
    %c0_i32 = arith.constant 0 : i32
    %c0_i32_0 = arith.constant 0 : i32
    return %arg1, %c0_i32 : i32, i32
  }
  func.func @transform_3(%arg0: i32, %arg1: i32) -> (i32, i32) {
    %c0_i32 = arith.constant 0 : i32
    %c0_i32_0 = arith.constant 0 : i32
    return %arg0, %c0_i32 : i32, i32
  }
}

</mosaic_0001>

<bundles_post_ra>
// kernel: tpu_custom_call.1
= control target key start
LH: loop header
LB: loop body
LE: loop exit
PB: predicated region body
PF: predicated region fallthrough
CT: control target
= control target key end

     0   :  { %8 = vsyncpa [#allocation4], 0  ;;  %s865_s0 = inlined_call_operand.vmem [shape: s32[16,1], index: 0, kind: input, shape index: {}]   ;;  %s866_s1 = inlined_call_operand.vmem [shape: f32[16,128], index: 1, kind: input, shape index: {}]   ;;  %s867_s2 = inlined_call_operand.hbm [shape: f32[64,128], index: 2, kind: input, shape index: {}]   ;;  %s868_s3 = inlined_call_operand.hbm [shape: f32[16,128], index: 3, kind: output, shape index: {}]  }
   0x1   :  { %9 = vsyncpa [#allocation5], 0 }
   0x2   :  { %11 = vsyncpa [#allocation5 + $0x1], 0  ;;  %s705_s12 = smov 0   ;;  %s707_s13 = smov 0  }
   0x3   :  { %s709_s14 = smov 0   ;;  %s711_s15 = smov 0  }
   0x4   :  { %s713_s16 = smov 0   ;;  %s715_s17 = smov 0  }
   0x5 LB: > { %s436_s18 = sadd.s32 4294967295, %s675_s17   ;;  %s437_s19 = sadd.s32 4294967294, %s675_s17   ;;  %s675_s17 = sphi %s715_s17, %s17_s17   ;;  %s671_s16 = sphi %s713_s16, %s886_s16   ;;  %s667_s15 = sphi %s711_s15, %s885_s15   ;;  %s663_s14 = sphi %s709_s14, %s884_s14   ;;  %s659_s13 = sphi %s707_s13, %s883_s13   ;;  %s655_s12 = sphi %s705_s12, %s882_s12  }
   0x6   : > { %s29_s20 = sadd.s32 1, %s671_s16  ;;  %s114_s21 = sadd.s32 1, %s663_s14 }
   0x7   : > { %p31_p0 = scmp.ge.s32.totalorder %s29_s20, 2  ;;  %p124_p1 = scmp.ne.s32.totalorder %s663_s14, %s659_s13 }
   0x8   : > { %p125_p2 = scmp.eq.s32.totalorder %s436_s18, 1  ;;  %p130_p3 = scmp.ne.s32.totalorder %s659_s13, %s655_s12 }
   0x9   : > { %s888_s20 = smov (%p31_p0, %s29_s20), 0  ;;  %p131_p5 = scmp.eq.s32.totalorder %s437_s19, 1 }
   0xa   : > { %p745_p4 = por %p125_p2, %p124_p1  ;;  %s111_s23 = ssub.s32 %s671_s16, %s888_s20 }
   0xb   : > { %p438_p6 = scmp.ge.s32.totalorder %s675_s17, 1  ;;  %p112_p7 = scmp.eq.s32.totalorder %s111_s23, 0 }
   0xc   : > { %s873_s22 = scalar_select %p745_p4, 1, 0 }
   0xd   : > { %p752_p8 = por %p131_p5, %p130_p3  ;;  %p138_p9 = scmp.lt.s32.totalorder %s675_s17, 3 }
   0xe   : > { %s758_s25 = scalar_select %p112_p7, %s663_s14, %s114_s21  }
   0xf   : > { %s874_s24 = scalar_select %p752_p8, 1, 0 }
  0x10   : > { %p760_p10 = pnand %p438_p6, %p138_p9  ;;  %p764_p11 = scmp.eq.s32.totalorder %s436_s18, 0 }
  0x11   : > { %s677_s28 = smov [#allocation3]   ;;  %s565_s6 = scalar_lea.hbm %s867_s2, 1024 }
  0x12   : > { %s875_s26 = scalar_select %p760_p10, 1, 0 }
  0x13   : > { %s876_s27 = scalar_select %p764_p11, 1, 0 }
  0x14   : > { %p498_p12 = pneg %p760_p10  ;;  %s153_s29 = sshll.u32 %s677_s28, 4  ;;  %s154_s29 = int_to_ptr.vmem [resolvable:$true] %s153_s29 }
  0x15   : > { %p566_p0 = scmp.ne.s32.totalorder %s867_s2, %s565_s6  ;;  %p572_p5 = scmp.lt.u32.totalorder %s565_s6, %s867_s2 }
  0x16   : > { %p772_p13 = pnand %p764_p11, %p498_p12 }
  0x18   : > { %p567_p1 = pneg %p772_p13 }
  0x1a   : > { %p568_p2 = pnand %p567_p1, %p566_p0 }
  0x1c   : > { %p569_p3 = pneg %p568_p2 }
  0x1e   : > { %p574_p6 = pnand %p572_p5, %p569_p3 }
  0x20   : > { %577 = shalt.err (!%p574_p6)
}
  0x21   : > { %s578_s11 = scalar_lea.vmem %s154_s29, 1024  ;;  %p586_p8 = scmp.lt.s32.totalorder %s154_s29, %s154_s29 }
  0x22   : > { %p579_p7 = scmp.ne.s32.totalorder %s154_s29, %s578_s11  ;;  %p587_p4 = scmp.lt.s32.totalorder %s578_s11, %s578_s11 }
  0x24   : > { %p581_p9 = pnand %p579_p7, %p567_p1  ;;  %p588_p11 = por %p587_p4, %p586_p8 }
  0x26   : > { %p582_p12 = pneg %p581_p9 }
  0x28   : > { %p589_p10 = pnand %p588_p11, %p582_p12 }
  0x2a   : > { %592 = shalt.err (!%p589_p10)
}
  0x2b   : > { %s678_s18 = smov 128   ;;  %s679_s19 = smov 8  }
  0x2c   : > { %501 = dma.hbm_to_vmem [thread:$0]  (!%p772_p13), %s867_s2, 1024, %s154_s29, [#allocation4], %s678_s18, %s678_s18, %s679_s19  }
  0x2d   : > { %p878_p0 = scmp.ne.s32.totalorder %s875_s26, 0 }
  0x2e   : > { %p879_p2 = scmp.ne.s32.totalorder (!%p878_p0), %s876_s27, 0 }
  0x2f   : > { %183 = sbr.rel (%p878_p0) target bundleno = 422 (0x1a6), region = 32 }
  0x36   : > { %646 = dma.done.wait (%p879_p2), [#allocation4], 1024  }
  0x37   : > { %648 = vsyncadd (%p879_p2), [#allocation4], 4294966272  ;;  %p210_p4 = scmp.lt.s32.totalorder %s667_s15, 1  ;;  %v680_v0 = vmov 0   ;;  %v681_v1 = vmov 0.0|0.0   ;;  %v237_v3 = vld [vmem:[#allocation3] sm:$0xff]  ;;  %v228_v16 = vlaneseq }
  0x38   : > { %564 = vset.pattern.permute.xlu0 %v680_v0  ;;  %480 = vmatprep.subr.bf16.mxu0 %v681_v1  ;;  %v238_v4 = vld [vmem:[#allocation3 + $0x8] sm:$0xff]  ;;  %v239_v6 = vld [vmem:[#allocation3 + $0x10] sm:$0xff]  ;;  %v240_v7 = vld [vmem:[#allocation3 + $0x18] sm:$0xff]  ;;  %vm682_vm0 = vmmov 0   ;;  %v683_v8 = vmov 0.0   ;;  %vm245_vm1 = vcmask 523264  }
  0x39   : > { %s800_s28 = scalar_select %p210_p4, %s667_s15, 1  ;;  %v481_v5 = vpack.c.bf16 %v238_v4, %v237_v3  ;;  %477 = vmatprep.mubr.msk.f32.mxu0 %vm682_vm0, %v683_v8  ;;  %v484_v9 = vpack.c.bf16 %v240_v7, %v239_v6  ;;  %v241_v10 = vld [vmem:[#allocation3 + $0x20] sm:$0xff]  ;;  %v242_v11 = vld [vmem:[#allocation3 + $0x28] sm:$0xff]  ;;  %v243_v13 = vld [vmem:[#allocation3 + $0x30] sm:$0xff]  ;;  %v229_v17 = vand.u32 127, %v228_v16 }
  0x3a   : > { %v487_v12 = vpack.c.bf16 %v242_v11, %v241_v10  ;;  %v244_v14 = vld [vmem:[#allocation3 + $0x38] sm:$0xff]  ;;  %s207_s27 = sand.u32 1, %s659_s13   ;;  %s449_s9 = sshll.u32 %s667_s15, 7 }
  0x3b   : > { %s444_s29 = sshll.u32 %s800_s28, 3  ;;  %482 = vmatpush3.bf16.msra.mxu0 %v481_v5  ;;  %v490_v15 = vpack.c.bf16 %v244_v14, %v243_v13  ;;  %s443_s5 = sshll.u32 %s207_s27, 3 }
  0x3c   : > { %s213_s4 = scalar_lea.vmem %s865_s0, %s444_s29  ;;  %483 = vmatprep.subr.bf16.mxu0 %v681_v1  ;;  %s217_s8 = scalar_lea.vmem %s866_s1, %s444_s29 }
  0x3d   : > { %v224_v2 = vld [vmem:[%s213_s4] sm:$0xff]  ;;  %s209_s10 = scalar_lea.vmem [#allocation6], %s443_s5  ;;  %s818_s21 = scalar_lea.hbm %s868_s3, %s449_s9 }
  0x3e   : > { %231 = vperm.xlu0 %564, %v224_v2   ;;  %v326_v21 = vld [vmem:[%s217_s8] sm:$0xff]  ;;  %s343_s11 = sshll.u32 %s209_s10, 4  ;;  %s330_s23 = scalar_lea.sflag [#allocation5], %s207_s27  ;;  %s820_s11 = int_to_ptr.vmem [resolvable:$true] %s343_s11 }
  0x3f   : > { %485 = vmatpush3.bf16.msra.mxu0 %v484_v9  ;;  %s593_s28 = scalar_lea.vmem %s820_s11, 128  ;;  %p880_p10 = scmp.ne.s32.totalorder %s873_s22, 0 }
  0x40   : > { %486 = vmatprep.subr.bf16.mxu0 %v681_v1  ;;  %p594_p8 = scmp.ne.s32.totalorder %s820_s11, %s593_s28  ;;  %s684_s15 = smov [#allocation6]  }
  0x41   : > { %s597_s29 = sshll.u32 %s684_s15, 4  ;;  %s598_s29 = int_to_ptr.vmem [resolvable:$false] %s597_s29 }
  0x42   : > { %p595_p11 = pnand %p594_p8, %p880_p10  ;;  %s599_s26 = scalar_lea.vmem %s598_s29, 256 }
  0x43   : > { %488 = vmatpush3.bf16.msra.mxu0 %v487_v12  ;;  %p600_p1 = scmp.lt.s32.totalorder %s820_s11, %s598_s29  ;;  %p601_p3 = scmp.lt.s32.totalorder %s599_s26, %s593_s28 }
  0x44   : > { %489 = vmatprep.subr.bf16.mxu0 %v681_v1  ;;  %p596_p13 = pneg %p595_p11 }
  0x45   : > { %p602_p5 = por %p601_p3, %p600_p1 }
  0x47   : > { %491 = vmatpush3.bf16.msra.mxu0 %v490_v15  ;;  %p603_p6 = pnand %p602_p5, %p596_p13 }
  0xbd   : > { %v232_v18 = vpop.permute.xlu0 %231 }
  0xbe   : > { %vm233_vm2 = vcmp.eq.s32.totalorder %v232_v18, %v229_v17 }
  0xbf   : > { %v446_v19 = vsel %vm233_vm2, 1.0, %v683_v8 }
  0xc0   : > { %478 = vmatmul.mubr.msk.f32.vlgmr.msra.gmra.mrb[0].mxu0 %vm245_vm1, %v446_v19 }
 0x193   : > { %v315_v20 = vpop.f32.mrb[0].mxu0 }
 0x194   : > { %v325_v22 = vmul.f32 11.313708, %v315_v20  ;;  %v479_v23 = vpop.f32.mrb[1].mxu0 }
 0x196   : > { %v327_v24 = vadd.f32 %v326_v21, %v325_v22 }
 0x198   : > { %328 = vst [vmem:[%s209_s10] sm:$0xff] %v327_v24 }
 0x199   : > { %606 = shalt.err (!%p603_p6)
}
 0x19a   : > { %s607_s30 = scalar_lea.hbm %s818_s21, 128  ;;  %s611_s5 = scalar_lea.hbm %s868_s3, 256 }
 0x19b   : > { %p608_p7 = scmp.ne.s32.totalorder %s818_s21, %s607_s30  ;;  %p612_p0 = scmp.lt.u32.totalorder %s818_s21, %s868_s3 }
 0x19c   : > { %p613_p2 = scmp.lt.u32.totalorder %s611_s5, %s607_s30  ;;  %p615_p8 = scmp.lt.u32.totalorder %s607_s30, %s818_s21 }
 0x19d   : > { %p609_p9 = pnand %p608_p7, %p880_p10 }
 0x19e   : > { %p614_p4 = por %p613_p2, %p612_p0 }
 0x19f   : > { %p610_p12 = pneg %p609_p9 }
 0x1a0   : > { %p616_p11 = por %p615_p8, %p614_p4 }
 0x1a2   : > { %p617_p13 = pnand %p616_p11, %p610_p12 }
 0x1a4   : > { %620 = shalt.err (!%p617_p13)
}
 0x1a5   : > { %496 = dma.vmem_to_hbm [thread:$0]  (%p880_p10), %s820_s11, 128, %s818_s21, %s330_s23  }
 0x1a6 PF: > { %p508_p1 = scmp.ge.s32.totalorder %s675_s17, 2  ;;  %s355_s8 = sand.u32 1, %s655_s12  }
 0x1a7   : > { %p881_p3 = scmp.ne.s32.totalorder %s874_s24, 0  ;;  %s356_s9 = scalar_lea.sflag [#allocation5], %s355_s8 }
 0x1a9   : > { %p503_p5 = pnand %p508_p1, %p881_p3 }
 0x1ab   : > { %650 = dma.done.wait (!%p503_p5), %s356_s9, 128  }
 0x1ac   : > { %652 = vsyncadd (!%p503_p5), %s356_s9, 4294967168  ;;  %s17_s17 = sadd.s32 1, %s675_s17   ;;  %s882_s12 = smov %s659_s13 }
 0x1ad   : > { %p14_p6 = scmp.ge.s32.totalorder %s17_s17, 4   ;;  %s883_s13 = smov %s663_s14 }
 0x1ae   : > { %s884_s14 = smov %s758_s25  ;;  %s885_s15 = smov %s671_s16 }
 0x1af   : > { %s886_s16 = smov %s888_s20  ;;  %16 = sbr.rel (!%p14_p6) target bundleno = 5 (0x5), region = 84 }
 0x1b6   :  { %361 = vsyncpa [#allocation4], 1 }
 0x1b7   :  { %363 = vsyncpa [#allocation4 + $0x1], 1 }
 0x1b8   :  { %364 = vsyncpa [#allocation5], 1 }
 0x1b9   :  { %366 = vsyncpa [#allocation5 + $0x1], 1 }

</bundles_post_ra>
